<compile_context>
chip_gen: v5e
topology: v5e:2x2
jax: 0.10.0
libtpu: 0.0.40
codegen_flags: <defaults>
</compile_context>

<pallas_src>
import jax
import jax.numpy as jnp
from jax.experimental import pallas as pl
from jax.experimental.pallas import tpu as pltpu


_LPAD = 8  # left zero-pad columns in the width-padded scratch (sublane aligned)


def _dwconv_kernel(x_ref, top_ref, bot_ref, w_ref, b_ref, o_ref, ctx_ref):
    # x_ref:   (1, h_blk, W, C)   rows of this output block (no halo)
    # top_ref: (1, 1, W, C)       row just above the block (clamped at image top)
    # bot_ref: (1, 1, W, C)       row just below the block (clamped at image bottom)
    # w_ref:   (3, 3, C)          depthwise taps, tap[kh, kw, c]
    # b_ref:   (1, C)             bias
    # o_ref:   (1, h_blk, W, C)   output block
    # ctx_ref: (h_blk+2, W_pad, C) f32 scratch: width/height padded row context
    h_blk = x_ref.shape[1]
    W = x_ref.shape[2]
    C = x_ref.shape[3]
    hb = pl.program_id(1)
    n_hb = pl.num_programs(1)
    f32 = jnp.float32

    # Zero ONLY the two pad columns the shifted windows actually read.
    # (Kept per-step on purpose: per-core scratch under megacore sharding.)
    zcol = jnp.zeros((h_blk + 2, 1, C), f32)
    ctx_ref[:, _LPAD - 1:_LPAD, :] = zcol
    ctx_ref[:, _LPAD + W:_LPAD + W + 1, :] = zcol

    # Body rows: cast to f32 once (hoisted out of the tap loop).
    ctx_ref[1:h_blk + 1, _LPAD:_LPAD + W, :] = x_ref[0].astype(f32)

    # Halo rows; zeroed at the image borders (padding=1 semantics).
    top = top_ref[0].astype(f32)                       # (1, W, C)
    bot = bot_ref[0].astype(f32)
    top = jnp.where(hb == 0, jnp.zeros_like(top), top)
    bot = jnp.where(hb == n_hb - 1, jnp.zeros_like(bot), bot)
    ctx_ref[0:1, _LPAD:_LPAD + W, :] = top
    ctx_ref[h_blk + 1:h_blk + 2, _LPAD:_LPAD + W, :] = bot

    taps = w_ref[...].astype(f32)                      # (3, 3, C), cast once
    # Accumulator seeded with the bias (broadcast hoisted out of the loop).
    acc = jnp.broadcast_to(b_ref[0].astype(f32).reshape(1, 1, C), (h_blk, W, C))
    for kh in range(3):                                # unrolled at trace time
        for kw in range(3):
            # Slice the scratch ref directly: kh = free major-axis offset,
            # kw = sublane shift; per-channel tap broadcasts on lanes.
            win = ctx_ref[kh:kh + h_blk, _LPAD + kw - 1:_LPAD + kw - 1 + W, :]
            acc = acc + win * taps[kh, kw]
    o_ref[0] = acc.astype(o_ref.dtype)


def _pick_h_block(H, target_rows, max_rows, floor):
    """Pick a divisor of H close to target_rows, avoiding pathological h_blk=1."""
    max_rows = max(1, min(int(max_rows), H))
    target_rows = max(1, min(int(target_rows), max_rows))
    divs = [d for d in range(1, H + 1) if H % d == 0]
    best = max(d for d in divs if d <= target_rows)
    if best < min(floor, H):
        # Tiny blocks make halo rows / per-step overhead dominate; take the
        # smallest divisor >= floor that still fits the VMEM ceiling.
        bigger = [d for d in divs if d >= min(floor, H) and d <= max_rows]
        if bigger:
            best = min(bigger)
        # TODO(synk): ragged last block (clamped index_map + masked store) for
        #             awkward/prime H where no good divisor exists.
    return best


def dwconv_pallas(x_nchw, weight, bias, *, h_block=None):
    """Depthwise 3x3 conv, stride 1, pad 1, groups=C, with bias (PyTorch DWConv).

    x_nchw: (N, C, H, W); weight: (C, 1, 3, 3); bias: (C,). Returns (N, C, H, W).
    """
    N, C, H, W = x_nchw.shape
    # NCHW -> NHWC so channels sit on the 128-lane axis inside the kernel.
    x = jnp.transpose(x_nchw, (0, 2, 3, 1))                  # (N, H, W, C)
    w_k = jnp.transpose(weight[:, 0, :, :], (1, 2, 0))       # (3, 3, C)
    b_k = bias.reshape(1, C)

    # Width-padded scratch geometry: 8 aligned zero columns on the left, data at
    # [8, 8+W), >=1 zero column on the right, total width a multiple of 8.
    w_pad = _LPAD + (W // 8 + 1) * 8

    # Per-output-row f32 working-set estimate: scratch row + double-buffered
    # input & output block rows + accumulator/temporaries.
    in_bytes = jnp.dtype(x_nchw.dtype).itemsize
    per_row = (w_pad * C * 4) + 4 * W * C * in_bytes + 2 * W * C * 4

    # Generation-aware budget: big blocks on 128-MiB-VMEM chips (v5e/v6e),
    # conservative sizing on v7x (64 MiB per TensorCore) / unknown.
    try:
        vmem_cap = getattr(pltpu.get_tpu_info(), "vmem_capacity_bytes", None)
    except Exception:  # pragma: no cover - interpret mode / older runtimes
        vmem_cap = None
    if vmem_cap is not None and vmem_cap >= 100 * 1024 * 1024:
        budget, vmem_limit = 24 << 20, 80 << 20
    else:
        budget, vmem_limit = 12 << 20, 32 << 20

    max_rows = max(1, ((vmem_limit * 3) // 4) // per_row)
    if h_block is None:
        target = max(1, budget // per_row)
        if N == 1 and H >= 2:
            # Keep >= 2 parallel grid points so both v7x TensorCores get work.
            target = min(target, max(1, H // 2))
        h_blk = _pick_h_block(H, target, max_rows, floor=16)
    else:
        h_blk = _pick_h_block(H, h_block, max_rows, floor=1)
    n_hb = H // h_blk

    def mid_idx(n, hb):
        return (n, hb, 0, 0)

    def top_idx(n, hb):  # row above the block, clamped at the top border
        return (n, jnp.maximum(hb * h_blk - 1, 0), 0, 0)

    def bot_idx(n, hb):  # row below the block, clamped at the bottom border
        return (n, jnp.minimum((hb + 1) * h_blk, H - 1), 0, 0)

    out_nhwc = pl.pallas_call(
        _dwconv_kernel,
        out_shape=jax.ShapeDtypeStruct((N, H, W, C), x_nchw.dtype),
        grid_spec=pltpu.PrefetchScalarGridSpec(
            num_scalar_prefetch=0,
            grid=(N, n_hb),
            in_specs=[
                pl.BlockSpec((1, h_blk, W, C), mid_idx),
                pl.BlockSpec((1, 1, W, C), top_idx),
                pl.BlockSpec((1, 1, W, C), bot_idx),
                pl.BlockSpec((3, 3, C), lambda n, hb: (0, 0, 0)),   # DMA'd once
                pl.BlockSpec((1, C), lambda n, hb: (0, 0)),         # DMA'd once
            ],
            out_specs=pl.BlockSpec((1, h_blk, W, C), mid_idx),
            scratch_shapes=[pltpu.VMEM((h_blk + 2, w_pad, C), jnp.float32)],
        ),
        compiler_params=pltpu.CompilerParams(
            dimension_semantics=("parallel", "parallel"),
            vmem_limit_bytes=vmem_limit,
        ),
    )(x, x, x, w_k, b_k)

    # NHWC -> NCHW to match PyTorch output convention.
    return jnp.transpose(out_nhwc, (0, 3, 1, 2))


def dwconv_reference(x_nchw, weight, bias):
    """Pure-JAX reference (lax conv with feature_group_count)."""
    C = x_nchw.shape[1]
    out = jax.lax.conv_general_dilated(
        x_nchw, weight,
        window_strides=(1, 1),
        padding=((1, 1), (1, 1)),
        feature_group_count=C,
        dimension_numbers=("NCHW", "OIHW", "NCHW"),
    )
    return out + bias.reshape(1, C, 1, 1)


if __name__ == "__main__":
    key = jax.random.PRNGKey(0)
    k_x, k_w, k_b = jax.random.split(key, 3)

    N, C, H, W = 2, 4, 16, 16  # small shapes; DWConv(dim=C)
    x = jax.random.normal(k_x, (N, C, H, W), dtype=jnp.float32)
    # Deterministic synthetic parameters (nn.Conv2d(C, C, 3, 1, 1, groups=C) shapes).
    weight = jax.random.normal(k_w, (C, 1, 3, 3), dtype=jnp.float32) * 0.1
    bias = jax.random.normal(k_b, (C,), dtype=jnp.float32) * 0.1

    ref = dwconv_reference(x, weight, bias)

    # h_block=8 -> two row-blocks per image: exercises the inter-block halo path
    # as well as the zeroed top/bottom image borders.
    out_blk = jax.block_until_ready(dwconv_pallas(x, weight, bias, h_block=8))
    assert out_blk.shape == ref.shape == (N, C, H, W)
    assert jnp.allclose(out_blk, ref, atol=1e-5, rtol=1e-5), "mismatch (h_block=8)"

    # Auto block sizing (single block per image here): exercises the
    # generation-aware sizing path and the full-image halo zeroing.
    out_auto = jax.block_until_ready(dwconv_pallas(x, weight, bias))
    assert jnp.allclose(out_auto, ref, atol=1e-5, rtol=1e-5), "mismatch (auto)"

    print("KERNEL_OK")
</pallas_src>

<mosaic_0001>
module attributes {stable_mosaic.version = 11 : i64} {
  func.func @_dwconv_kernel(%arg0: i32, %arg1: i32, %arg2: memref<1x8x16x4xf32, #tpu.memory_space<vmem>>, %arg3: memref<1x1x16x4xf32, #tpu.memory_space<vmem>>, %arg4: memref<1x1x16x4xf32, #tpu.memory_space<vmem>>, %arg5: memref<3x3x4xf32, #tpu.memory_space<vmem>>, %arg6: memref<1x4xf32, #tpu.memory_space<vmem>>, %arg7: memref<1x8x16x4xf32, #tpu.memory_space<vmem>>, %arg8: memref<10x32x4xf32, #tpu.memory_space<vmem>>) attributes {dimension_semantics = [#tpu.dimension_semantics<parallel>, #tpu.dimension_semantics<parallel>], iteration_bounds = array<i64: 2, 2>, scalar_prefetch = 0 : i64, scratch_operands = 1 : i64, tpu.core_type = #tpu.core_type<tc>, window_params = [{transform_indices = @transform_0, window_bounds = array<i64: 1, 8, 16, 4>}, {transform_indices = @transform_1, window_bounds = array<i64: 1, 1, 16, 4>}, {transform_indices = @transform_2, window_bounds = array<i64: 1, 1, 16, 4>}, {pipeline_mode = #tpu.pipeline_mode<synchronous>, transform_indices = @transform_3, window_bounds = array<i64: 3, 3, 4>}, {pipeline_mode = #tpu.pipeline_mode<synchronous>, transform_indices = @transform_4, window_bounds = array<i64: 1, 4>}, {transform_indices = @transform_5, window_bounds = array<i64: 1, 8, 16, 4>}]} {
    %cst = arith.constant 0.000000e+00 : f32
    %0 = vector.broadcast %cst : f32 to vector<10x1x4xf32>
    %c0 = arith.constant 0 : index
    %c7 = arith.constant 7 : index
    %c0_0 = arith.constant 0 : index
    %1 = vector.load %arg8[%c0, %c7, %c0_0] : memref<10x32x4xf32, #tpu.memory_space<vmem>>, vector<10x1x4xf32>
    tpu.vector_store %arg8[%c0, %c7, %c0_0], %0 {strides = array<i32>} : memref<10x32x4xf32, #tpu.memory_space<vmem>>, vector<10x1x4xf32>,
    %c0_1 = arith.constant 0 : index
    %c24 = arith.constant 24 : index
    %c0_2 = arith.constant 0 : index
    %2 = vector.load %arg8[%c0_1, %c24, %c0_2] : memref<10x32x4xf32, #tpu.memory_space<vmem>>, vector<10x1x4xf32>
    tpu.vector_store %arg8[%c0_1, %c24, %c0_2], %0 {strides = array<i32>} : memref<10x32x4xf32, #tpu.memory_space<vmem>>, vector<10x1x4xf32>,
    %c0_3 = arith.constant 0 : index
    %c0_4 = arith.constant 0 : index
    %c0_5 = arith.constant 0 : index
    %c0_6 = arith.constant 0 : index
    %3 = vector.load %arg2[%c0_3, %c0_4, %c0_5, %c0_6] : memref<1x8x16x4xf32, #tpu.memory_space<vmem>>, vector<1x8x16x4xf32>
    %4 = vector.shape_cast %3 : vector<1x8x16x4xf32> to vector<8x16x4xf32>
    %c1 = arith.constant 1 : index
    %c8 = arith.constant 8 : index
    %c0_7 = arith.constant 0 : index
    %5 = vector.load %arg8[%c1, %c8, %c0_7] : memref<10x32x4xf32, #tpu.memory_space<vmem>>, vector<8x16x4xf32>
    tpu.vector_store %arg8[%c1, %c8, %c0_7], %4 {strides = array<i32>} : memref<10x32x4xf32, #tpu.memory_space<vmem>>, vector<8x16x4xf32>,
    %c0_8 = arith.constant 0 : index
    %c0_9 = arith.constant 0 : index
    %c0_10 = arith.constant 0 : index
    %c0_11 = arith.constant 0 : index
    %6 = vector.load %arg3[%c0_8, %c0_9, %c0_10, %c0_11] : memref<1x1x16x4xf32, #tpu.memory_space<vmem>>, vector<1x1x16x4xf32>
    %7 = vector.shape_cast %6 : vector<1x1x16x4xf32> to vector<1x16x4xf32>
    %c0_12 = arith.constant 0 : index
    %c0_13 = arith.constant 0 : index
    %c0_14 = arith.constant 0 : index
    %c0_15 = arith.constant 0 : index
    %8 = vector.load %arg4[%c0_12, %c0_13, %c0_14, %c0_15] : memref<1x1x16x4xf32, #tpu.memory_space<vmem>>, vector<1x1x16x4xf32>
    %9 = vector.shape_cast %8 : vector<1x1x16x4xf32> to vector<1x16x4xf32>
    %c0_i32 = arith.constant 0 : i32
    %10 = arith.cmpi eq, %arg1, %c0_i32 : i32
    %cst_16 = arith.constant 0.000000e+00 : f32
    %11 = vector.broadcast %cst_16 : f32 to vector<1x16x4xf32>
    %12 = arith.select %10, %11, %7 : vector<1x16x4xf32>
    %c1_i32 = arith.constant 1 : i32
    %13 = arith.cmpi eq, %arg1, %c1_i32 : i32
    %cst_17 = arith.constant 0.000000e+00 : f32
    %14 = vector.broadcast %cst_17 : f32 to vector<1x16x4xf32>
    %15 = arith.select %13, %14, %9 : vector<1x16x4xf32>
    %c0_18 = arith.constant 0 : index
    %c8_19 = arith.constant 8 : index
    %c0_20 = arith.constant 0 : index
    %16 = vector.load %arg8[%c0_18, %c8_19, %c0_20] : memref<10x32x4xf32, #tpu.memory_space<vmem>>, vector<1x16x4xf32>
    tpu.vector_store %arg8[%c0_18, %c8_19, %c0_20], %12 {strides = array<i32>} : memref<10x32x4xf32, #tpu.memory_space<vmem>>, vector<1x16x4xf32>,
    %c9 = arith.constant 9 : index
    %c8_21 = arith.constant 8 : index
    %c0_22 = arith.constant 0 : index
    %17 = vector.load %arg8[%c9, %c8_21, %c0_22] : memref<10x32x4xf32, #tpu.memory_space<vmem>>, vector<1x16x4xf32>
    tpu.vector_store %arg8[%c9, %c8_21, %c0_22], %15 {strides = array<i32>} : memref<10x32x4xf32, #tpu.memory_space<vmem>>, vector<1x16x4xf32>,
    %c0_23 = arith.constant 0 : index
    %c0_24 = arith.constant 0 : index
    %c0_25 = arith.constant 0 : index
    %18 = vector.load %arg5[%c0_23, %c0_24, %c0_25] : memref<3x3x4xf32, #tpu.memory_space<vmem>>, vector<3x3x4xf32>
    %c0_26 = arith.constant 0 : index
    %c0_27 = arith.constant 0 : index
    %19 = vector.load %arg6[%c0_26, %c0_27] : memref<1x4xf32, #tpu.memory_space<vmem>>, vector<1x4xf32>
    %20 = vector.shape_cast %19 : vector<1x4xf32> to vector<4xf32>
    %21 = vector.shape_cast %20 : vector<4xf32> to vector<1x1x4xf32>
    %22 = vector.shape_cast %21 : vector<1x1x4xf32> to vector<1x1x4xf32>
    %23 = vector.broadcast %22 : vector<1x1x4xf32> to vector<8x16x4xf32>
    %c0_28 = arith.constant 0 : index
    %c7_29 = arith.constant 7 : index
    %c0_30 = arith.constant 0 : index
    %24 = vector.load %arg8[%c0_28, %c7_29, %c0_30] : memref<10x32x4xf32, #tpu.memory_space<vmem>>, vector<8x16x4xf32>
    %25 = vector.extract_strided_slice %18 {offsets = [0, 0, 0], sizes = [1, 1, 4], strides = [1, 1, 1]} : vector<3x3x4xf32> to vector<1x1x4xf32>
    %26 = vector.shape_cast %25 : vector<1x1x4xf32> to vector<4xf32>
    %27 = vector.shape_cast %26 : vector<4xf32> to vector<1x1x4xf32>
    %28 = vector.broadcast %27 : vector<1x1x4xf32> to vector<8x16x4xf32>
    %29 = arith.mulf %24, %28 : vector<8x16x4xf32>
    %30 = arith.addf %23, %29 : vector<8x16x4xf32>
    %c0_31 = arith.constant 0 : index
    %c8_32 = arith.constant 8 : index
    %c0_33 = arith.constant 0 : index
    %31 = vector.load %arg8[%c0_31, %c8_32, %c0_33] : memref<10x32x4xf32, #tpu.memory_space<vmem>>, vector<8x16x4xf32>
    %32 = vector.extract_strided_slice %18 {offsets = [0, 1, 0], sizes = [1, 1, 4], strides = [1, 1, 1]} : vector<3x3x4xf32> to vector<1x1x4xf32>
    %33 = vector.shape_cast %32 : vector<1x1x4xf32> to vector<4xf32>
    %34 = vector.shape_cast %33 : vector<4xf32> to vector<1x1x4xf32>
    %35 = vector.broadcast %34 : vector<1x1x4xf32> to vector<8x16x4xf32>
    %36 = arith.mulf %31, %35 : vector<8x16x4xf32>
    %37 = arith.addf %30, %36 : vector<8x16x4xf32>
    %c0_34 = arith.constant 0 : index
    %c9_35 = arith.constant 9 : index
    %c0_36 = arith.constant 0 : index
    %38 = vector.load %arg8[%c0_34, %c9_35, %c0_36] : memref<10x32x4xf32, #tpu.memory_space<vmem>>, vector<8x16x4xf32>
    %39 = vector.extract_strided_slice %18 {offsets = [0, 2, 0], sizes = [1, 1, 4], strides = [1, 1, 1]} : vector<3x3x4xf32> to vector<1x1x4xf32>
    %40 = vector.shape_cast %39 : vector<1x1x4xf32> to vector<4xf32>
    %41 = vector.shape_cast %40 : vector<4xf32> to vector<1x1x4xf32>
    %42 = vector.broadcast %41 : vector<1x1x4xf32> to vector<8x16x4xf32>
    %43 = arith.mulf %38, %42 : vector<8x16x4xf32>
    %44 = arith.addf %37, %43 : vector<8x16x4xf32>
    %c1_37 = arith.constant 1 : index
    %c7_38 = arith.constant 7 : index
    %c0_39 = arith.constant 0 : index
    %45 = vector.load %arg8[%c1_37, %c7_38, %c0_39] : memref<10x32x4xf32, #tpu.memory_space<vmem>>, vector<8x16x4xf32>
    %46 = vector.extract_strided_slice %18 {offsets = [1, 0, 0], sizes = [1, 1, 4], strides = [1, 1, 1]} : vector<3x3x4xf32> to vector<1x1x4xf32>
    %47 = vector.shape_cast %46 : vector<1x1x4xf32> to vector<4xf32>
    %48 = vector.shape_cast %47 : vector<4xf32> to vector<1x1x4xf32>
    %49 = vector.broadcast %48 : vector<1x1x4xf32> to vector<8x16x4xf32>
    %50 = arith.mulf %45, %49 : vector<8x16x4xf32>
    %51 = arith.addf %44, %50 : vector<8x16x4xf32>
    %c1_40 = arith.constant 1 : index
    %c8_41 = arith.constant 8 : index
    %c0_42 = arith.constant 0 : index
    %52 = vector.load %arg8[%c1_40, %c8_41, %c0_42] : memref<10x32x4xf32, #tpu.memory_space<vmem>>, vector<8x16x4xf32>
    %53 = vector.extract_strided_slice %18 {offsets = [1, 1, 0], sizes = [1, 1, 4], strides = [1, 1, 1]} : vector<3x3x4xf32> to vector<1x1x4xf32>
    %54 = vector.shape_cast %53 : vector<1x1x4xf32> to vector<4xf32>
    %55 = vector.shape_cast %54 : vector<4xf32> to vector<1x1x4xf32>
    %56 = vector.broadcast %55 : vector<1x1x4xf32> to vector<8x16x4xf32>
    %57 = arith.mulf %52, %56 : vector<8x16x4xf32>
    %58 = arith.addf %51, %57 : vector<8x16x4xf32>
    %c1_43 = arith.constant 1 : index
    %c9_44 = arith.constant 9 : index
    %c0_45 = arith.constant 0 : index
    %59 = vector.load %arg8[%c1_43, %c9_44, %c0_45] : memref<10x32x4xf32, #tpu.memory_space<vmem>>, vector<8x16x4xf32>
    %60 = vector.extract_strided_slice %18 {offsets = [1, 2, 0], sizes = [1, 1, 4], strides = [1, 1, 1]} : vector<3x3x4xf32> to vector<1x1x4xf32>
    %61 = vector.shape_cast %60 : vector<1x1x4xf32> to vector<4xf32>
    %62 = vector.shape_cast %61 : vector<4xf32> to vector<1x1x4xf32>
    %63 = vector.broadcast %62 : vector<1x1x4xf32> to vector<8x16x4xf32>
    %64 = arith.mulf %59, %63 : vector<8x16x4xf32>
    %65 = arith.addf %58, %64 : vector<8x16x4xf32>
    %c2 = arith.constant 2 : index
    %c7_46 = arith.constant 7 : index
    %c0_47 = arith.constant 0 : index
    %66 = vector.load %arg8[%c2, %c7_46, %c0_47] : memref<10x32x4xf32, #tpu.memory_space<vmem>>, vector<8x16x4xf32>
    %67 = vector.extract_strided_slice %18 {offsets = [2, 0, 0], sizes = [1, 1, 4], strides = [1, 1, 1]} : vector<3x3x4xf32> to vector<1x1x4xf32>
    %68 = vector.shape_cast %67 : vector<1x1x4xf32> to vector<4xf32>
    %69 = vector.shape_cast %68 : vector<4xf32> to vector<1x1x4xf32>
    %70 = vector.broadcast %69 : vector<1x1x4xf32> to vector<8x16x4xf32>
    %71 = arith.mulf %66, %70 : vector<8x16x4xf32>
    %72 = arith.addf %65, %71 : vector<8x16x4xf32>
    %c2_48 = arith.constant 2 : index
    %c8_49 = arith.constant 8 : index
    %c0_50 = arith.constant 0 : index
    %73 = vector.load %arg8[%c2_48, %c8_49, %c0_50] : memref<10x32x4xf32, #tpu.memory_space<vmem>>, vector<8x16x4xf32>
    %74 = vector.extract_strided_slice %18 {offsets = [2, 1, 0], sizes = [1, 1, 4], strides = [1, 1, 1]} : vector<3x3x4xf32> to vector<1x1x4xf32>
    %75 = vector.shape_cast %74 : vector<1x1x4xf32> to vector<4xf32>
    %76 = vector.shape_cast %75 : vector<4xf32> to vector<1x1x4xf32>
    %77 = vector.broadcast %76 : vector<1x1x4xf32> to vector<8x16x4xf32>
    %78 = arith.mulf %73, %77 : vector<8x16x4xf32>
    %79 = arith.addf %72, %78 : vector<8x16x4xf32>
    %c2_51 = arith.constant 2 : index
    %c9_52 = arith.constant 9 : index
    %c0_53 = arith.constant 0 : index
    %80 = vector.load %arg8[%c2_51, %c9_52, %c0_53] : memref<10x32x4xf32, #tpu.memory_space<vmem>>, vector<8x16x4xf32>
    %81 = vector.extract_strided_slice %18 {offsets = [2, 2, 0], sizes = [1, 1, 4], strides = [1, 1, 1]} : vector<3x3x4xf32> to vector<1x1x4xf32>
    %82 = vector.shape_cast %81 : vector<1x1x4xf32> to vector<4xf32>
    %83 = vector.shape_cast %82 : vector<4xf32> to vector<1x1x4xf32>
    %84 = vector.broadcast %83 : vector<1x1x4xf32> to vector<8x16x4xf32>
    %85 = arith.mulf %80, %84 : vector<8x16x4xf32>
    %86 = arith.addf %79, %85 : vector<8x16x4xf32>
    %c0_54 = arith.constant 0 : index
    %c0_55 = arith.constant 0 : index
    %c0_56 = arith.constant 0 : index
    %c0_57 = arith.constant 0 : index
    %87 = vector.load %arg7[%c0_54, %c0_55, %c0_56, %c0_57] : memref<1x8x16x4xf32, #tpu.memory_space<vmem>>, vector<1x8x16x4xf32>
    %88 = vector.shape_cast %87 : vector<1x8x16x4xf32> to vector<8x16x4xf32>
    %89 = vector.shape_cast %86 : vector<8x16x4xf32> to vector<1x8x16x4xf32>
    tpu.vector_store %arg7[%c0_54, %c0_55, %c0_56, %c0_57], %89 {strides = array<i32>} : memref<1x8x16x4xf32, #tpu.memory_space<vmem>>, vector<1x8x16x4xf32>,
    return
  }
  func.func @transform_0(%arg0: i32, %arg1: i32) -> (i32, i32, i32, i32) {
    %c0_i32 = arith.constant 0 : i32
    %c0_i32_0 = arith.constant 0 : i32
    %c0_i32_1 = arith.constant 0 : i32
    return %arg0, %arg1, %c0_i32, %c0_i32_0 : i32, i32, i32, i32
  }
  func.func @transform_1(%arg0: i32, %arg1: i32) -> (i32, i32, i32, i32) {
    %c8_i32 = arith.constant 8 : i32
    %0 = arith.muli %arg1, %c8_i32 : i32
    %c1_i32 = arith.constant 1 : i32
    %1 = arith.subi %0, %c1_i32 : i32
    %c0_i32 = arith.constant 0 : i32
    %2 = arith.maxsi %1, %c0_i32 : i32
    %c0_i32_0 = arith.constant 0 : i32
    %c0_i32_1 = arith.constant 0 : i32
    %c0_i32_2 = arith.constant 0 : i32
    return %arg0, %2, %c0_i32_0, %c0_i32_1 : i32, i32, i32, i32
  }
  func.func @transform_2(%arg0: i32, %arg1: i32) -> (i32, i32, i32, i32) {
    %c1_i32 = arith.constant 1 : i32
    %0 = arith.addi %arg1, %c1_i32 : i32
    %c8_i32 = arith.constant 8 : i32
    %1 = arith.muli %0, %c8_i32 : i32
    %c15_i32 = arith.constant 15 : i32
    %2 = arith.minsi %1, %c15_i32 : i32
    %c0_i32 = arith.constant 0 : i32
    %c0_i32_0 = arith.constant 0 : i32
    %c0_i32_1 = arith.constant 0 : i32
    return %arg0, %2, %c0_i32, %c0_i32_0 : i32, i32, i32, i32
  }
  func.func @transform_3(%arg0: i32, %arg1: i32) -> (i32, i32, i32) {
    %c0_i32 = arith.constant 0 : i32
    %c0_i32_0 = arith.constant 0 : i32
    %c0_i32_1 = arith.constant 0 : i32
    %c0_i32_2 = arith.constant 0 : i32
    return %c0_i32, %c0_i32_0, %c0_i32_1 : i32, i32, i32
  }
  func.func @transform_4(%arg0: i32, %arg1: i32) -> (i32, i32) {
    %c0_i32 = arith.constant 0 : i32
    %c0_i32_0 = arith.constant 0 : i32
    %c0_i32_1 = arith.constant 0 : i32
    return %c0_i32, %c0_i32_0 : i32, i32
  }
  func.func @transform_5(%arg0: i32, %arg1: i32) -> (i32, i32, i32, i32) {
    %c0_i32 = arith.constant 0 : i32
    %c0_i32_0 = arith.constant 0 : i32
    %c0_i32_1 = arith.constant 0 : i32
    return %arg0, %arg1, %c0_i32, %c0_i32_0 : i32, i32, i32, i32
  }
}

</mosaic_0001>

<bundles_post_ra>
// kernel: tpu_custom_call.1
= control target key start
LH: loop header
LB: loop body
LE: loop exit
PB: predicated region body
PF: predicated region fallthrough
CT: control target
= control target key end

     0   :  { %s1246_s18 = smov 0   ;;  %s1248_s19 = smov 0   ;;  %s1761_s0 = inlined_call_operand.vmem [shape: f32[2,16,16,4], index: 0, kind: input, shape index: {}]   ;;  %s1762_s1 = inlined_call_operand.vmem [shape: f32[2,16,16,4], index: 1, kind: input, shape index: {}]   ;;  %s1763_s2 = inlined_call_operand.vmem [shape: f32[2,16,16,4], index: 2, kind: input, shape index: {}]   ;;  %s1764_s3 = inlined_call_operand.vmem [shape: f32[3,3,4], index: 3, kind: input, shape index: {}]   ;;  %s1765_s4 = inlined_call_operand.vmem [shape: f32[1,4], index: 4, kind: input, shape index: {}]   ;;  %s1766_s5 = inlined_call_operand.vmem [shape: f32[2,16,16,4], index: 5, kind: output, shape index: {}]  }
   0x1   :  { %s1250_s20 = smov 0   ;;  %s1252_s21 = smov 0  }
   0x2   :  { %s1254_s22 = smov 0  }
   0x3 LB: > { %s24_s23 = sadd.s32 1, %s1205_s20  ;;  %s27_s24 = sadd.s32 1, %s1209_s21  ;;  %s1213_s22 = sphi %s1254_s22, %s15_s22   ;;  %s1209_s21 = sphi %s1252_s21, %s1771_s21   ;;  %s1205_s20 = sphi %s1250_s20, %s1770_s20   ;;  %s1201_s19 = sphi %s1248_s19, %s1769_s19   ;;  %s1197_s18 = sphi %s1246_s18, %s1768_s18  }
   0x4   : > { %p25_p0 = scmp.ge.s32.totalorder %s24_s23, 2  ;;  %p1085_p1 = scmp.ge.s32.totalorder %s1213_s22, 1 }
   0x5   : > { %p273_p2 = scmp.lt.s32.totalorder %s1213_s22, 5 }
   0x6   : > { %s1773_s23 = smov (%p25_p0, %s24_s23), 0  ;;  %s1775_s24 = smov (!%p25_p0, %s27_s24), %s1209_s21 }
   0x7   : > { %p274_p3 = pnand %p1085_p1, %p273_p2  ;;  %p29_p4 = scmp.ge.s32.totalorder %s1775_s24, 2 }
   0x8   : > { %s1086_s25 = sshll.u32 (!%p274_p3), %s1197_s18, 3  ;;  %p338_p5 = scmp.lt.s32.totalorder (!%p274_p3), %s1201_s19, 1 }
   0x9   : > { %s1777_s24 = smov (%p29_p4, %s1775_s24), 0  ;;  %277 = sbr.rel (%p274_p3) target bundleno = 127 (0x7f), region = 40 }
   0xa   : > { %p340_p6 = scmp.lt.s32.totalorder (!%p274_p3), %s1086_s25, 15  ;;  %s1091_s26 = sadd.s32 (!%p274_p3), 4294967295, %s1086_s25 }
   0xb   : > { %p350_p7 = scmp.gt.s32.totalorder (!%p274_p3), %s1091_s26, 0  ;;  %s1120_s6 = sadd.s32 (!%p274_p3), 8, %s1086_s25 }
   0xc   : > { %p1092_p8 = scmp.lt.s32.totalorder (!%p274_p3), %s1091_s26, 15  ;;  %p1292_p9 = scmp.lt.s32.totalorder (!%p274_p3), %s1120_s6, 15 }
   0xd   : > { %p452_p10 = scmp.eq.s32.totalorder (!%p274_p3), %s1197_s18, 0  ;;  %p458_p11 = scmp.eq.s32.totalorder (!%p274_p3), %s1197_s18, 1 }
   0xe   : > { %vm393_vm0 = vcmask 24576   ;;  %v1215_v0 = vmov 0.0   ;;  %s1779_s19 = smov (!%p338_p5, %s1201_s19), 1  ;;  %s1781_s26 = smov (!%p350_p7, %s1091_s26), 0  ;;  %vm431_vm1 = vcmask 31744  }
   0xf   : > { %395 = vst.msk [vmem:[#allocation2 + $0x27] sm:$0x1] %vm393_vm0, %v1215_v0  ;;  %s341_s27 = scalar_select %p340_p6, %s1086_s25, 15  ;;  %v469_v6 = vld [vmem:[%s1764_s3] sm:$0x7] }
  0x10   : > { %394 = vst.msk [vmem:[#allocation2 + $0x7] sm:$0x1] %vm393_vm0, %v1215_v0  ;;  %s1283_s28 = sshll.u32 %s1779_s19, 5  ;;  %s1783_s6 = smov (!%p1292_p9, %s1120_s6), 15  ;;  %v470_v9 = vld [vmem:[%s1764_s3 + $0x4] sm:$0x7] }
  0x11   : > { %396 = vst.msk [vmem:[#allocation2 + $0x47] sm:$0x1] %vm393_vm0, %v1215_v0  ;;  %s1087_s29 = sshll.u32 %s341_s27, 1  ;;  %s1785_s26 = smov (!%p1092_p8, %s1781_s26), 15  ;;  %v1350_v13 = vperm.slane %v469_v6, 0  ;;  %v1352_v14 = vperm.slane %v469_v6, 1 }
  0x12   : > { %397 = vst.msk [vmem:[#allocation2 + $0x67] sm:$0x1] %vm393_vm0, %v1215_v0  ;;  %s1289_s30 = sadd.s32 %s1283_s28, %s1087_s29  ;;  %s1787_s6 = smov (!%p1292_p9, %s1783_s6), 15  ;;  %v471_v16 = vld [vmem:[%s1764_s3 + $0x8] sm:$0x7]  ;;  %v1370_v19 = vperm.slane %v469_v6, 2 }
  0x13   : > { %398 = vst.msk [vmem:[#allocation2 + $0x87] sm:$0x1] %vm393_vm0, %v1215_v0  ;;  %s1089_s8 = sshll.u32 %s1289_s30, 3  ;;  %s1097_s12 = sshll.u32 %s1785_s26, 1  ;;  %v1368_v18 = vld [vmem:[%s1765_s4] ss:$0 sm:$0xff] }
  0x14   : > { %399 = vst.msk [vmem:[#allocation2 + $0xa7] sm:$0x1] %vm393_vm0, %v1215_v0  ;;  %s1311_s11 = scalar_lea.vmem %s1761_s0, %s1089_s8  ;;  %s358_s13 = sadd.s32 %s1097_s12, %s1283_s28  ;;  %v1377_v22 = vperm.slane %v470_v9, 0  ;;  %v1386_v26 = vperm.slane %v470_v9, 1  ;;  %v1395_v31 = vperm.slane %v470_v9, 2  ;;  %v1397_v32 = vperm.slane %v471_v16, 0 }
  0x15   : > { %400 = vst.msk [vmem:[#allocation2 + $0xc7] sm:$0x1] %vm393_vm0, %v1215_v0  ;;  %v414_v1 = vld [vmem:[%s1311_s11] sm:$0xff]  ;;  %v415_v2 = vld [vmem:[%s1311_s11 + $0x8] sm:$0xff]  ;;  %v416_v3 = vld [vmem:[%s1311_s11 + $0x10] sm:$0xff]  ;;  %s1104_s14 = sshll.u32 %s1787_s6, 1  ;;  %s1523_s19 = scalar_lea.vmem %s1766_s5, %s1089_s8 }
  0x16   : > { %401 = vst.msk [vmem:[#allocation2 + $0xe7] sm:$0x1] %vm393_vm0, %v1215_v0  ;;  %v417_v4 = vld [vmem:[%s1311_s11 + $0x18] sm:$0xff]  ;;  %v418_v5 = vld [vmem:[%s1311_s11 + $0x20] sm:$0xff]  ;;  %s1099_s15 = sshll.u32 %s358_s13, 3  ;;  %v419_v7 = vld [vmem:[%s1311_s11 + $0x28] sm:$0xff]  ;;  %s375_s6 = sadd.s32 %s1104_s14, %s1283_s28 }
  0x17   : > { %402 = vst.msk [vmem:[#allocation2 + $0x107] sm:$0x1] %vm393_vm0, %v1215_v0  ;;  %v420_v8 = vld [vmem:[%s1311_s11 + $0x30] sm:$0xff]  ;;  %v421_v10 = vld [vmem:[%s1311_s11 + $0x38] sm:$0xff]  ;;  %v422_v11 = vld [vmem:[%s1311_s11 + $0x40] sm:$0xff]  ;;  %s1347_s29 = scalar_lea.vmem %s1762_s1, %s1099_s15  ;;  %s1106_s28 = sshll.u32 %s375_s6, 3 }
  0x18   : > { %403 = vst.msk [vmem:[#allocation2 + $0x127] sm:$0x1] %vm393_vm0, %v1215_v0  ;;  %v423_v12 = vld [vmem:[%s1311_s11 + $0x48] sm:$0xff]  ;;  %v424_v15 = vld [vmem:[%s1311_s11 + $0x50] sm:$0xff]  ;;  %s1358_s7 = scalar_select %p452_p10, 0, 255 }
  0x19   : > { %404 = vst.msk [vmem:[#allocation2 + $0x18] sm:$0x1] %vm393_vm0, %v1215_v0  ;;  %v425_v17 = vld [vmem:[%s1311_s11 + $0x58] sm:$0xff]  ;;  %v426_v29 = vld [vmem:[%s1311_s11 + $0x60] sm:$0xff]  ;;  %v427_v30 = vld [vmem:[%s1311_s11 + $0x68] sm:$0xff]  ;;  %s1411_s16 = scalar_lea.vmem %s1763_s2, %s1106_s28  ;;  %v1420_v41 = vperm.slane %v471_v16, 1 }
  0x1a   : > { %405 = vst.msk [vmem:[#allocation2 + $0x38] sm:$0x1] %vm393_vm0, %v1215_v0  ;;  %v1164_v36 = vld [vmem:[%s1347_s29] sm:%s1358_s7]  ;;  %v1422_v42 = vperm.slane %v471_v16, 2  ;;  %v1167_v43 = vld [vmem:[%s1347_s29 + $0x8] sm:%s1358_s7] }
  0x1b   : > { %406 = vst.msk [vmem:[#allocation2 + $0x58] sm:$0x1] %vm393_vm0, %v1215_v0  ;;  %s1429_s17 = scalar_select %p458_p11, 0, 255  ;;  %v428_v53 = vld [vmem:[%s1311_s11 + $0x70] sm:$0xff]  ;;  %v429_v59 = vld [vmem:[%s1311_s11 + $0x78] sm:$0xff] }
  0x1c   : > { %407 = vst.msk [vmem:[#allocation2 + $0x78] sm:$0x1] %vm393_vm0, %v1215_v0 }
  0x1d   : > { %408 = vst.msk [vmem:[#allocation2 + $0x98] sm:$0x1] %vm393_vm0, %v1215_v0 }
  0x1e   : > { %409 = vst.msk [vmem:[#allocation2 + $0xb8] sm:$0x1] %vm393_vm0, %v1215_v0 }
  0x1f   : > { %410 = vst.msk [vmem:[#allocation2 + $0xd8] sm:$0x1] %vm393_vm0, %v1215_v0 }
  0x20   : > { %411 = vst.msk [vmem:[#allocation2 + $0xf8] sm:$0x1] %vm393_vm0, %v1215_v0 }
  0x21   : > { %412 = vst.msk [vmem:[#allocation2 + $0x118] sm:$0x1] %vm393_vm0, %v1215_v0 }
  0x22   : > { %413 = vst.msk [vmem:[#allocation2 + $0x138] sm:$0x1] %vm393_vm0, %v1215_v0 }
  0x23   : > { %432 = vst.msk [vmem:[#allocation2 + $0x28] sm:$0xff] %vm431_vm1, %v414_v1 }
  0x24   : > { %433 = vst.msk [vmem:[#allocation2 + $0x30] sm:$0xff] %vm431_vm1, %v415_v2  ;;  %v1170_v2 = vld [vmem:[%s1411_s16] sm:%s1429_s17] }
  0x25   : > { %434 = vst.msk [vmem:[#allocation2 + $0x48] sm:$0xff] %vm431_vm1, %v416_v3 }
  0x26   : > { %435 = vst.msk [vmem:[#allocation2 + $0x50] sm:$0xff] %vm431_vm1, %v417_v4 }
  0x27   : > { %436 = vst.msk [vmem:[#allocation2 + $0x68] sm:$0xff] %vm431_vm1, %v418_v5 }
  0x28   : > { %437 = vst.msk [vmem:[#allocation2 + $0x70] sm:$0xff] %vm431_vm1, %v419_v7 }
  0x29   : > { %438 = vst.msk [vmem:[#allocation2 + $0x88] sm:$0xff] %vm431_vm1, %v420_v8  ;;  %v1173_v8 = vld [vmem:[%s1411_s16 + $0x8] sm:%s1429_s17] }
  0x2a   : > { %439 = vst.msk [vmem:[#allocation2 + $0x90] sm:$0xff] %vm431_vm1, %v421_v10  ;;  %v1373_v20 = vld [vmem:[#allocation2 + $0x27] sm:$0xff] }
  0x2b   : > { %v1375_v21 = vld [vmem:[#allocation2 + $0x28] sm:$0xff]  ;;  %440 = vst.msk [vmem:[#allocation2 + $0xa8] sm:$0xff] %vm431_vm1, %v422_v11  ;;  %v495_v23 = vmul.f32 %v1350_v13, %v1373_v20  ;;  %v1390_v28 = vld [vmem:[#allocation2 + $0x30] sm:$0xff] }
  0x2c   : > { %v544_v24 = vmul.f32 %v1352_v14, %v1375_v21  ;;  %v1384_v25 = vld [vmem:[#allocation2 + $0x29] sm:$0xff]  ;;  %441 = vst.msk [vmem:[#allocation2 + $0xb0] sm:$0xff] %vm431_vm1, %v423_v12  ;;  %v545_v34 = vmul.f32 %v1352_v14, %v1390_v28  ;;  %v1403_v35 = vld [vmem:[#allocation2 + $0x31] sm:$0xff] }
  0x2d   : > { %v1388_v27 = vld [vmem:[#allocation2 + $0x2f] sm:$0xff]  ;;  %442 = vst.msk [vmem:[#allocation2 + $0xc8] sm:$0xff] %vm431_vm1, %v424_v15  ;;  %v511_v37 = vadd.f32 %v1368_v18, %v495_v23  ;;  %v593_v38 = vmul.f32 %v1370_v19, %v1384_v25  ;;  %v1431_v44 = vld [vmem:[#allocation2 + $0x47] sm:$0xff]  ;;  %v594_v46 = vmul.f32 %v1370_v19, %v1403_v35 }
  0x2e   : > { %v496_v33 = vmul.f32 %v1350_v13, %v1388_v27  ;;  %v1416_v39 = vld [vmem:[#allocation2 + $0x48] sm:$0xff]  ;;  %443 = vst.msk [vmem:[#allocation2 + $0xd0] sm:$0xff] %vm431_vm1, %v425_v17  ;;  %v1436_v47 = vld [vmem:[#allocation2 + $0x50] sm:$0xff]  ;;  %v642_v49 = vmul.f32 %v1377_v22, %v1431_v44  ;;  %v497_v0 = vmul.f32 %v1431_v44, %v1350_v13 }
  0x2f   : > { %v1418_v40 = vld [vmem:[#allocation2 + $0x49] sm:$0xff]  ;;  %444 = vst.msk [vmem:[#allocation2 + $0xe8] sm:$0xff] %vm431_vm1, %v426_v29  ;;  %v560_v48 = vadd.f32 %v544_v24, %v511_v37  ;;  %v1443_v52 = vld [vmem:[#allocation2 + $0x51] sm:$0xff]  ;;  %v691_v54 = vmul.f32 %v1386_v26, %v1416_v39  ;;  %v692_v62 = vmul.f32 %v1386_v26, %v1436_v47  ;;  %v546_v1 = vmul.f32 %v1416_v39, %v1352_v14 }
  0x30   : > { %v512_v45 = vadd.f32 %v1368_v18, %v496_v33  ;;  %v822_v50 = vld [vmem:[#allocation2 + $0x68] sm:$0xff]  ;;  %445 = vst.msk [vmem:[#allocation2 + $0xf0] sm:$0xff] %vm431_vm1, %v427_v30  ;;  %v740_v55 = vmul.f32 %v1395_v31, %v1418_v40  ;;  %v1459_v63 = vld [vmem:[#allocation2 + $0x70] sm:$0xff]  ;;  %v741_v6 = vmul.f32 %v1395_v31, %v1443_v52  ;;  %v513_v12 = vadd.f32 %v1368_v18, %v497_v0 }
  0x31   : > { %v1441_v51 = vld [vmem:[#allocation2 + $0x4f] sm:$0xff]  ;;  %464 = vst.msk [vmem:[#allocation2 + $0x8] sm:$0xff] %vm431_vm1, %v1164_v36  ;;  %v609_v60 = vadd.f32 %v593_v38, %v560_v48  ;;  %v773_v61 = vld [vmem:[#allocation2 + $0x67] sm:$0xff]  ;;  %v839_v4 = vmul.f32 %v1420_v41, %v822_v50  ;;  %v595_v15 = vmul.f32 %v1418_v40, %v1370_v19  ;;  %v840_v23 = vmul.f32 %v1420_v41, %v1459_v63 }
  0x32   : > { %v1451_v56 = vld [vmem:[#allocation2 + $0x69] sm:$0xff]  ;;  %v561_v57 = vadd.f32 %v545_v34, %v512_v45  ;;  %v643_v58 = vmul.f32 %v1377_v22, %v1441_v51  ;;  %465 = vst.msk [vmem:[#allocation2 + $0x10] sm:$0xff] %vm431_vm1, %v1167_v43  ;;  %v790_v3 = vmul.f32 %v1397_v32, %v773_v61  ;;  %v1472_v7 = vld [vmem:[#allocation2 + $0x71] sm:$0xff]  ;;  %v498_v24 = vmul.f32 %v1441_v51, %v1350_v13 }
  0x33   : > { %446 = vst.msk [vmem:[#allocation2 + $0x108] sm:$0xff] %vm431_vm1, %v428_v53  ;;  %v658_v9 = vadd.f32 %v642_v49, %v609_v60  ;;  %v888_v10 = vmul.f32 %v1422_v42, %v1451_v56  ;;  %v774_v11 = vld [vmem:[#allocation2 + $0x6f] sm:$0xff]  ;;  %v889_v30 = vmul.f32 %v1422_v42, %v1472_v7  ;;  %v562_v33 = vadd.f32 %v546_v1, %v513_v12 }
  0x34   : > { %v610_v5 = vadd.f32 %v594_v46, %v561_v57  ;;  %447 = vst.msk [vmem:[#allocation2 + $0x110] sm:$0xff] %vm431_vm1, %v429_v59  ;;  %v791_v17 = vmul.f32 %v1397_v32, %v774_v11  ;;  %v1491_v34 = vld [vmem:[#allocation2 + $0x88] sm:$0xff]  ;;  %v547_v36 = vmul.f32 %v1436_v47, %v1352_v14  ;;  %v644_v38 = vmul.f32 %v773_v61, %v1377_v22 }
  0x35   : > { %467 = vst.msk [vmem:[#allocation2 + $0x128] sm:$0xff] %vm431_vm1, %v1170_v2  ;;  %v707_v29 = vadd.f32 %v691_v54, %v658_v9  ;;  %v514_v43 = vadd.f32 %v1368_v18, %v498_v24  ;;  %v596_v45 = vmul.f32 %v1443_v52, %v1370_v19  ;;  %v611_v48 = vadd.f32 %v595_v15, %v562_v33  ;;  %v775_v54 = vld [vmem:[#allocation2 + $0x87] sm:$0xff] }
  0x36   : > { %v659_v16 = vadd.f32 %v643_v58, %v610_v5  ;;  %468 = vst.msk [vmem:[#allocation2 + $0x130] sm:$0xff] %vm431_vm1, %v1173_v8  ;;  %v693_v49 = vmul.f32 %v822_v50, %v1386_v26  ;;  %v742_v53 = vmul.f32 %v1451_v56, %v1395_v31  ;;  %v1503_v57 = vld [vmem:[#allocation2 + $0x89] sm:$0xff]  ;;  %v792_v59 = vmul.f32 %v1397_v32, %v775_v54 }
  0x37   : > { %v756_v46 = vadd.f32 %v740_v55, %v707_v29  ;;  %v841_v60 = vmul.f32 %v1420_v41, %v1491_v34  ;;  %v660_v1 = vadd.f32 %v644_v38, %v611_v48  ;;  %v499_v55 = vmul.f32 %v773_v61, %v1350_v13  ;;  %v776_v29 = vld [vmem:[#allocation2 + $0x8f] sm:$0xff] }
  0x38   : > { %v708_v37 = vadd.f32 %v692_v62, %v659_v16  ;;  %v563_v62 = vadd.f32 %v547_v36, %v514_v43  ;;  %v548_v2 = vmul.f32 %v822_v50, %v1352_v14  ;;  %v890_v8 = vmul.f32 %v1422_v42, %v1503_v57  ;;  %v1513_v16 = vld [vmem:[#allocation2 + $0x90] sm:$0xff] }
  0x39   : > { %v806_v0 = vadd.f32 %v790_v3, %v756_v46  ;;  %v709_v15 = vadd.f32 %v693_v49, %v660_v1  ;;  %v515_v24 = vadd.f32 %v1368_v18, %v499_v55  ;;  %v597_v3 = vmul.f32 %v1451_v56, %v1370_v19 }
  0x3a   : > { %v757_v58 = vadd.f32 %v741_v6, %v708_v37  ;;  %v612_v9 = vadd.f32 %v596_v45, %v563_v62  ;;  %v645_v6 = vmul.f32 %v774_v11, %v1377_v22  ;;  %v793_v56 = vmul.f32 %v1397_v32, %v776_v29  ;;  %v874_v37 = vld [vmem:[#allocation2 + $0x91] sm:$0xff]  ;;  %v1536_v62 = vld [vmem:[#allocation2 + $0xa8] sm:$0xff] }
  0x3b   : > { %v855_v12 = vadd.f32 %v839_v4, %v806_v0  ;;  %v694_v4 = vmul.f32 %v1459_v63, %v1386_v26  ;;  %v758_v36 = vadd.f32 %v742_v53, %v709_v15  ;;  %v564_v38 = vadd.f32 %v548_v2, %v515_v24 }
  0x3c   : > { %v807_v5 = vadd.f32 %v791_v17, %v757_v58  ;;  %v661_v61 = vadd.f32 %v645_v6, %v612_v9  ;;  %v743_v17 = vmul.f32 %v1472_v7, %v1395_v31  ;;  %v500_v46 = vmul.f32 %v774_v11, %v1350_v13 }
  0x3d   : > { %v904_v33 = vadd.f32 %v888_v10, %v855_v12  ;;  %v808_v48 = vadd.f32 %v792_v59, %v758_v36  ;;  %v613_v49 = vadd.f32 %v597_v3, %v564_v38  ;;  %v646_v58 = vmul.f32 %v775_v54, %v1377_v22 }
  0x3e   : > { %v856_v50 = vadd.f32 %v840_v23, %v807_v5  ;;  %v710_v45 = vadd.f32 %v694_v4, %v661_v61  ;;  %v842_v23 = vmul.f32 %v1420_v41, %v1513_v16  ;;  %v549_v10 = vmul.f32 %v1459_v63, %v1352_v14  ;;  %v777_v63 = vld [vmem:[#allocation2 + $0xa7] sm:$0xff] }
  0x3f   : > { %920 = vst.msk [vmem:[%s1523_s19 + $0x10] sm:$0xff] %vm431_vm1, %v904_v33  ;;  %v891_v53 = vmul.f32 %v1422_v42, %v874_v37  ;;  %v516_v0 = vadd.f32 %v1368_v18, %v500_v46  ;;  %v598_v11 = vmul.f32 %v1472_v7, %v1370_v19  ;;  %v857_v1 = vadd.f32 %v841_v60, %v808_v48  ;;  %v1550_v5 = vld [vmem:[#allocation2 + $0xa9] sm:$0xff] }
  0x40   : > { %v905_v43 = vadd.f32 %v889_v30, %v856_v50  ;;  %v759_v30 = vadd.f32 %v743_v17, %v710_v45  ;;  %v662_v59 = vadd.f32 %v646_v58, %v613_v49  ;;  %v695_v55 = vmul.f32 %v1491_v34, %v1386_v26  ;;  %v827_v33 = vld [vmem:[#allocation2 + $0xb0] sm:$0xff] }
  0x41   : > { %v744_v2 = vmul.f32 %v1503_v57, %v1395_v31  ;;  %v794_v6 = vmul.f32 %v1397_v32, %v777_v63  ;;  %v843_v12 = vmul.f32 %v1420_v41, %v1536_v62  ;;  %v565_v15 = vadd.f32 %v549_v10, %v516_v0 }
  0x42   : > { %921 = vst.msk [vmem:[%s1523_s19 + $0x18] sm:$0xff] %vm431_vm1, %v905_v43  ;;  %v809_v9 = vadd.f32 %v793_v56, %v759_v30  ;;  %v906_v7 = vadd.f32 %v890_v8, %v857_v1  ;;  %v711_v60 = vadd.f32 %v695_v55, %v662_v59  ;;  %v501_v24 = vmul.f32 %v775_v54, %v1350_v13  ;;  %v778_v56 = vld [vmem:[#allocation2 + $0xaf] sm:$0xff]  ;;  %v779_v55 = vld [vmem:[#allocation2 + $0xc7] sm:$0xff] }
  0x43   : > { %v550_v3 = vmul.f32 %v1491_v34, %v1352_v14  ;;  %v892_v61 = vmul.f32 %v1422_v42, %v1550_v5  ;;  %v614_v4 = vadd.f32 %v598_v11, %v565_v15  ;;  %v647_v17 = vmul.f32 %v776_v29, %v1377_v22  ;;  %v1565_v54 = vld [vmem:[#allocation2 + $0xb1] sm:$0xff] }
  0x44   : > { %v858_v50 = vadd.f32 %v842_v23, %v809_v9  ;;  %922 = vst.msk [vmem:[%s1523_s19 + $0x20] sm:$0xff] %vm431_vm1, %v906_v7  ;;  %v760_v36 = vadd.f32 %v744_v2, %v711_v60  ;;  %v696_v8 = vmul.f32 %v1513_v16, %v1386_v26  ;;  %v517_v34 = vadd.f32 %v1368_v18, %v501_v24  ;;  %v1583_v2 = vld [vmem:[#allocation2 + $0xc9] sm:$0xff] }
  0x45   : > { %v599_v38 = vmul.f32 %v1503_v57, %v1370_v19  ;;  %v663_v45 = vadd.f32 %v647_v17, %v614_v4  ;;  %v745_v23 = vmul.f32 %v874_v37, %v1395_v31  ;;  %v795_v46 = vmul.f32 %v1397_v32, %v778_v56 }
  0x46   : > { %v907_v43 = vadd.f32 %v891_v53, %v858_v50  ;;  %v810_v48 = vadd.f32 %v794_v6, %v760_v36  ;;  %v844_v49 = vmul.f32 %v1420_v41, %v827_v33  ;;  %v566_v58 = vadd.f32 %v550_v3, %v517_v34  ;;  %v1579_v53 = vld [vmem:[#allocation2 + $0xc8] sm:$0xff] }
  0x47   : > { %v502_v10 = vmul.f32 %v776_v29, %v1350_v13  ;;  %v712_v30 = vadd.f32 %v696_v8, %v663_v45  ;;  %v893_v0 = vmul.f32 %v1422_v42, %v1565_v54  ;;  %v648_v57 = vmul.f32 %v777_v63, %v1377_v22 }
  0x48   : > { %923 = vst.msk [vmem:[%s1523_s19 + $0x28] sm:$0xff] %vm431_vm1, %v907_v43  ;;  %v551_v11 = vmul.f32 %v1513_v16, %v1352_v14  ;;  %v859_v1 = vadd.f32 %v843_v12, %v810_v48  ;;  %v615_v59 = vadd.f32 %v599_v38, %v566_v58  ;;  %v600_v9 = vmul.f32 %v874_v37, %v1370_v19  ;;  %v1596_v37 = vld [vmem:[#allocation2 + $0xd0] sm:$0xff] }
  0x49   : > { %v518_v29 = vadd.f32 %v1368_v18, %v502_v10  ;;  %v761_v6 = vadd.f32 %v745_v23, %v712_v30  ;;  %v697_v15 = vmul.f32 %v1536_v62, %v1386_v26  ;;  %v746_v7 = vmul.f32 %v1550_v5, %v1395_v31  ;;  %v780_v23 = vld [vmem:[#allocation2 + $0xcf] sm:$0xff] }
  0x4a   : > { %v796_v60 = vmul.f32 %v1397_v32, %v779_v55  ;;  %v908_v16 = vadd.f32 %v892_v61, %v859_v1  ;;  %v664_v12 = vadd.f32 %v648_v57, %v615_v59  ;;  %v845_v24 = vmul.f32 %v1420_v41, %v1579_v53 }
  0x4b   : > { %v567_v3 = vadd.f32 %v551_v11, %v518_v29  ;;  %v811_v50 = vadd.f32 %v795_v46, %v761_v6  ;;  %v894_v4 = vmul.f32 %v1422_v42, %v1583_v2  ;;  %v503_v17 = vmul.f32 %v777_v63, %v1350_v13  ;;  %v1607_v46 = vld [vmem:[#allocation2 + $0xd1] sm:$0xff]  ;;  %v1620_v6 = vld [vmem:[#allocation2 + $0xe8] sm:$0xff] }
  0x4c   : > { %v552_v36 = vmul.f32 %v1536_v62, %v1352_v14  ;;  %924 = vst.msk [vmem:[%s1523_s19 + $0x30] sm:$0xff] %vm431_vm1, %v908_v16  ;;  %v713_v8 = vadd.f32 %v697_v15, %v664_v12  ;;  %v649_v34 = vmul.f32 %v778_v56, %v1377_v22  ;;  %v698_v38 = vmul.f32 %v827_v33, %v1386_v26 }
  0x4d   : > { %v616_v61 = vadd.f32 %v600_v9, %v567_v3  ;;  %v860_v43 = vadd.f32 %v844_v49, %v811_v50  ;;  %v747_v45 = vmul.f32 %v1565_v54, %v1395_v31  ;;  %v519_v63 = vadd.f32 %v1368_v18, %v503_v17 }
  0x4e   : > { %v601_v62 = vmul.f32 %v1550_v5, %v1370_v19  ;;  %v762_v48 = vadd.f32 %v746_v7, %v713_v8  ;;  %v797_v10 = vmul.f32 %v1397_v32, %v780_v23  ;;  %v846_v30 = vmul.f32 %v1420_v41, %v1596_v37  ;;  %v781_v7 = vld [vmem:[#allocation2 + $0xe7] sm:$0xff] }
  0x4f   : > { %v665_v58 = vadd.f32 %v649_v34, %v616_v61  ;;  %v909_v49 = vadd.f32 %v893_v0, %v860_v43  ;;  %v568_v57 = vadd.f32 %v552_v36, %v519_v63  ;;  %v504_v11 = vmul.f32 %v778_v56, %v1350_v13  ;;  %v879_v36 = vld [vmem:[#allocation2 + $0xe9] sm:$0xff] }
  0x50   : > { %v553_v1 = vmul.f32 %v827_v33, %v1352_v14  ;;  %v812_v59 = vadd.f32 %v796_v60, %v762_v48  ;;  %v895_v9 = vmul.f32 %v1422_v42, %v1607_v46  ;;  %v650_v5 = vmul.f32 %v779_v55, %v1377_v22  ;;  %v1638_v63 = vld [vmem:[#allocation2 + $0xf0] sm:$0xff] }
  0x51   : > { %v714_v29 = vadd.f32 %v698_v38, %v665_v58  ;;  %925 = vst.msk [vmem:[%s1523_s19 + $0x38] sm:$0xff] %vm431_vm1, %v909_v49  ;;  %v617_v15 = vadd.f32 %v601_v62, %v568_v57  ;;  %v699_v0 = vmul.f32 %v1579_v53, %v1386_v26  ;;  %v520_v56 = vadd.f32 %v1368_v18, %v504_v11 }
  0x52   : > { %v602_v33 = vmul.f32 %v1565_v54, %v1370_v19  ;;  %v861_v60 = vadd.f32 %v845_v24, %v812_v59  ;;  %v748_v12 = vmul.f32 %v1583_v2, %v1395_v31  ;;  %v798_v3 = vmul.f32 %v1397_v32, %v781_v7 }
  0x53   : > { %v763_v16 = vadd.f32 %v747_v45, %v714_v29  ;;  %v666_v50 = vadd.f32 %v650_v5, %v617_v15  ;;  %v847_v17 = vmul.f32 %v1420_v41, %v1620_v6  ;;  %v569_v8 = vadd.f32 %v553_v1, %v520_v56  ;;  %v880_v1 = vld [vmem:[#allocation2 + $0xf1] sm:$0xff] }
  0x54   : > { %v505_v61 = vmul.f32 %v779_v55, %v1350_v13  ;;  %v910_v34 = vadd.f32 %v894_v4, %v861_v60  ;;  %v651_v54 = vmul.f32 %v780_v23, %v1377_v22  ;;  %v554_v24 = vmul.f32 %v1579_v53, %v1352_v14  ;;  %v832_v60 = vld [vmem:[#allocation2 + $0x108] sm:$0xff] }
  0x55   : > { %v813_v38 = vadd.f32 %v797_v10, %v763_v16  ;;  %v715_v43 = vadd.f32 %v699_v0, %v666_v50  ;;  %v618_v45 = vadd.f32 %v602_v33, %v569_v8  ;;  %v603_v48 = vmul.f32 %v1583_v2, %v1370_v19  ;;  %v782_v10 = vld [vmem:[#allocation2 + $0xef] sm:$0xff] }
  0x56   : > { %v521_v62 = vadd.f32 %v1368_v18, %v505_v61  ;;  %926 = vst.msk [vmem:[%s1523_s19 + $0x40] sm:$0xff] %vm431_vm1, %v910_v34  ;;  %v896_v55 = vmul.f32 %v1422_v42, %v879_v36  ;;  %v700_v4 = vmul.f32 %v1596_v37, %v1386_v26  ;;  %v749_v53 = vmul.f32 %v1607_v46, %v1395_v31  ;;  %v783_v61 = vld [vmem:[#allocation2 + $0x107] sm:$0xff] }
  0x57   : > { %v862_v58 = vadd.f32 %v846_v30, %v813_v38  ;;  %v764_v49 = vadd.f32 %v748_v12, %v715_v43  ;;  %v667_v57 = vadd.f32 %v651_v54, %v618_v45  ;;  %v799_v11 = vmul.f32 %v1397_v32, %v782_v10  ;;  %v881_v54 = vld [vmem:[#allocation2 + $0x109] sm:$0xff] }
  0x58   : > { %v570_v59 = vadd.f32 %v554_v24, %v521_v62  ;;  %v848_v30 = vmul.f32 %v1420_v41, %v1638_v63  ;;  %v506_v29 = vmul.f32 %v780_v23, %v1350_v13  ;;  %v555_v5 = vmul.f32 %v1596_v37, %v1352_v14 }
  0x59   : > { %v911_v2 = vadd.f32 %v895_v9, %v862_v58  ;;  %v814_v15 = vadd.f32 %v798_v3, %v764_v49  ;;  %v716_v0 = vadd.f32 %v700_v4, %v667_v57  ;;  %v652_v33 = vmul.f32 %v781_v7, %v1377_v22 }
  0x5a   : > { %v619_v56 = vadd.f32 %v603_v48, %v570_v59  ;;  %v897_v16 = vmul.f32 %v1422_v42, %v880_v1  ;;  %v701_v9 = vmul.f32 %v1620_v6, %v1386_v26  ;;  %v522_v12 = vadd.f32 %v1368_v18, %v506_v29 }
  0x5b   : > { %927 = vst.msk [vmem:[%s1523_s19 + $0x48] sm:$0xff] %vm431_vm1, %v911_v2  ;;  %v604_v23 = vmul.f32 %v1607_v46, %v1370_v19  ;;  %v863_v50 = vadd.f32 %v847_v17, %v814_v15  ;;  %v765_v37 = vadd.f32 %v749_v53, %v716_v0  ;;  %v750_v8 = vmul.f32 %v879_v36, %v1395_v31  ;;  %v833_v2 = vld [vmem:[#allocation2 + $0x110] sm:$0xff] }
  0x5c   : > { %v668_v3 = vadd.f32 %v652_v33, %v619_v56  ;;  %v800_v34 = vmul.f32 %v1397_v32, %v783_v61  ;;  %v849_v38 = vmul.f32 %v1420_v41, %v832_v60  ;;  %v571_v24 = vadd.f32 %v555_v5, %v522_v12 }
  0x5d   : > { %v507_v43 = vmul.f32 %v781_v7, %v1350_v13  ;;  %v912_v45 = vadd.f32 %v896_v55, %v863_v50  ;;  %v815_v62 = vadd.f32 %v799_v11, %v765_v37  ;;  %v556_v46 = vmul.f32 %v1620_v6, %v1352_v14  ;;  %v784_v11 = vld [vmem:[#allocation2 + $0x10f] sm:$0xff] }
  0x5e   : > { %v717_v48 = vadd.f32 %v701_v9, %v668_v3  ;;  %v620_v17 = vadd.f32 %v604_v23, %v571_v24  ;;  %v653_v58 = vmul.f32 %v782_v10, %v1377_v22  ;;  %v605_v53 = vmul.f32 %v879_v36, %v1370_v19  ;;  %v785_v23 = vld [vmem:[#allocation2 + $0x127] sm:$0xff] }
  0x5f   : > { %v523_v4 = vadd.f32 %v1368_v18, %v507_v43  ;;  %928 = vst.msk [vmem:[%s1523_s19 + $0x50] sm:$0xff] %vm431_vm1, %v912_v45  ;;  %v864_v49 = vadd.f32 %v848_v30, %v815_v62  ;;  %v898_v59 = vmul.f32 %v1422_v42, %v881_v54  ;;  %v702_v7 = vmul.f32 %v1638_v63, %v1386_v26  ;;  %v882_v30 = vld [vmem:[#allocation2 + $0x111] sm:$0xff]  ;;  %v883_v45 = vld [vmem:[#allocation2 + $0x129] sm:$0xff] }
  0x60   : > { %v766_v57 = vadd.f32 %v750_v8, %v717_v48  ;;  %v669_v55 = vadd.f32 %v653_v58, %v620_v17  ;;  %v751_v6 = vmul.f32 %v880_v1, %v1395_v31  ;;  %v654_v5 = vmul.f32 %v783_v61, %v1377_v22 }
  0x61   : > { %v572_v29 = vadd.f32 %v556_v46, %v523_v4  ;;  %v913_v15 = vadd.f32 %v897_v16, %v864_v49  ;;  %v801_v0 = vmul.f32 %v1397_v32, %v784_v11  ;;  %v508_v56 = vmul.f32 %v782_v10, %v1350_v13  ;;  %v834_v16 = vld [vmem:[#allocation2 + $0x128] sm:$0xff] }
  0x62   : > { %v816_v36 = vadd.f32 %v800_v34, %v766_v57  ;;  %v718_v33 = vadd.f32 %v702_v7, %v669_v55  ;;  %v703_v12 = vmul.f32 %v832_v60, %v1386_v26  ;;  %v557_v50 = vmul.f32 %v1638_v63, %v1352_v14  ;;  %v476_v34 = vld [vmem:[#allocation2 + $0x7] sm:$0xff]  ;;  %v786_v4 = vld [vmem:[#allocation2 + $0x12f] sm:$0xff] }
  0x63   : > { %v621_v9 = vadd.f32 %v605_v53, %v572_v29  ;;  %929 = vst.msk [vmem:[%s1523_s19 + $0x58] sm:$0xff] %vm431_vm1, %v913_v15  ;;  %v850_v3 = vmul.f32 %v1420_v41, %v833_v2  ;;  %v524_v8 = vadd.f32 %v1368_v18, %v508_v56  ;;  %v606_v61 = vmul.f32 %v880_v1, %v1370_v19  ;;  %v525_v46 = vld [vmem:[#allocation2 + $0x8] sm:$0xff]  ;;  %v835_v53 = vld [vmem:[#allocation2 + $0x130] sm:$0xff] }
  0x64   : > { %v865_v37 = vadd.f32 %v849_v38, %v816_v36  ;;  %v767_v10 = vadd.f32 %v751_v6, %v718_v33  ;;  %v899_v24 = vmul.f32 %v1422_v42, %v882_v30  ;;  %v752_v43 = vmul.f32 %v881_v54, %v1395_v31  ;;  %v574_v57 = vld [vmem:[#allocation2 + $0x9] sm:$0xff] }
  0x65   : > { %v670_v60 = vadd.f32 %v654_v5, %v621_v9  ;;  %v802_v62 = vmul.f32 %v1397_v32, %v785_v23  ;;  %v573_v38 = vadd.f32 %v557_v50, %v524_v8  ;;  %v655_v48 = vmul.f32 %v784_v11, %v1377_v22  ;;  %v477_v6 = vld [vmem:[#allocation2 + $0xf] sm:$0xff] }
  0x66   : > { %v914_v63 = vadd.f32 %v898_v59, %v865_v37  ;;  %v817_v17 = vadd.f32 %v801_v0, %v767_v10  ;;  %v851_v1 = vmul.f32 %v1420_v41, %v834_v16  ;;  %v493_v49 = vmul.f32 %v1350_v13, %v476_v34  ;;  %v526_v9 = vld [vmem:[#allocation2 + $0x10] sm:$0xff] }
  0x67   : > { %v719_v58 = vadd.f32 %v703_v12, %v670_v60  ;;  %v900_v54 = vmul.f32 %v1422_v42, %v883_v45  ;;  %v622_v59 = vadd.f32 %v606_v61, %v573_v38  ;;  %v704_v7 = vmul.f32 %v833_v2, %v1386_v26  ;;  %v575_v50 = vld [vmem:[#allocation2 + $0x11] sm:$0xff] }
  0x68   : > { %930 = vst.msk [vmem:[%s1523_s19 + $0x60] sm:$0xff] %vm431_vm1, %v914_v63  ;;  %v753_v55 = vmul.f32 %v882_v30, %v1395_v31  ;;  %v866_v11 = vadd.f32 %v850_v3, %v817_v17  ;;  %v509_v5 = vadd.f32 %v1368_v18, %v493_v49  ;;  %v542_v15 = vmul.f32 %v1352_v14, %v525_v46  ;;  %v884_v34 = vld [vmem:[#allocation2 + $0x131] sm:$0xff] }
  0x69   : > { %v768_v29 = vadd.f32 %v752_v43, %v719_v58  ;;  %v671_v36 = vadd.f32 %v655_v48, %v622_v59  ;;  %v803_v0 = vmul.f32 %v1397_v32, %v786_v4  ;;  %v852_v56 = vmul.f32 %v1420_v41, %v835_v53 }
  0x6a   : > { %v591_v33 = vmul.f32 %v1370_v19, %v574_v57  ;;  %v915_v12 = vadd.f32 %v899_v24, %v866_v11  ;;  %v558_v23 = vadd.f32 %v542_v15, %v509_v5  ;;  %v494_v30 = vmul.f32 %v1350_v13, %v477_v6 }
  0x6b   : > { %v818_v2 = vadd.f32 %v802_v62, %v768_v29  ;;  %v720_v37 = vadd.f32 %v704_v7, %v671_v36  ;;  %v640_v3 = vmul.f32 %v1377_v22, %v1373_v20  ;;  %v689_v16 = vmul.f32 %v1386_v26, %v1375_v21 }
  0x6c   : > { %v641_v8 = vmul.f32 %v1377_v22, %v1388_v27  ;;  %931 = vst.msk [vmem:[%s1523_s19 + $0x68] sm:$0xff] %vm431_vm1, %v915_v12  ;;  %v607_v10 = vadd.f32 %v591_v33, %v558_v23  ;;  %v510_v24 = vadd.f32 %v1368_v18, %v494_v30  ;;  %v543_v13 = vmul.f32 %v1352_v14, %v526_v9 }
  0x6d   : > { %v867_v61 = vadd.f32 %v851_v1, %v818_v2  ;;  %v769_v60 = vadd.f32 %v753_v55, %v720_v37  ;;  %v592_v43 = vmul.f32 %v1370_v19, %v575_v50  ;;  %v789_v20 = vmul.f32 %v1397_v32, %v1441_v51 }
  0x6e   : > { %v838_v21 = vmul.f32 %v1420_v41, %v1436_v47  ;;  %v656_v27 = vadd.f32 %v640_v3, %v607_v10  ;;  %v559_v45 = vadd.f32 %v543_v13, %v510_v24  ;;  %v887_v63 = vmul.f32 %v1422_v42, %v1443_v52 }
  0x6f   : > { %v916_v22 = vadd.f32 %v900_v54, %v867_v61  ;;  %v819_v62 = vadd.f32 %v803_v0, %v769_v60  ;;  %v901_v18 = vmul.f32 %v1422_v42, %v884_v34  ;;  %v738_v19 = vmul.f32 %v1395_v31, %v1384_v25 }
  0x70   : > { %v705_v14 = vadd.f32 %v689_v16, %v656_v27  ;;  %v608_v51 = vadd.f32 %v592_v43, %v559_v45  ;;  %v788_v48 = vmul.f32 %v1397_v32, %v1431_v44  ;;  %v690_v52 = vmul.f32 %v1386_v26, %v1390_v28 }
  0x71   : > { %932 = vst.msk [vmem:[%s1523_s19 + $0x70] sm:$0xff] %vm431_vm1, %v916_v22  ;;  %v868_v38 = vadd.f32 %v852_v56, %v819_v62  ;;  %v837_v1 = vmul.f32 %v1420_v41, %v1416_v39  ;;  %v739_v25 = vmul.f32 %v1395_v31, %v1403_v35  ;;  %v886_v32 = vmul.f32 %v1422_v42, %v1418_v40 }
  0x72   : > { %v754_v47 = vadd.f32 %v738_v19, %v705_v14  ;;  %v657_v46 = vadd.f32 %v641_v8, %v608_v51 }
  0x73   : > { %v917_v17 = vadd.f32 %v901_v18, %v868_v38 }
  0x74   : > { %v804_v58 = vadd.f32 %v788_v48, %v754_v47  ;;  %v706_v4 = vadd.f32 %v690_v52, %v657_v46 }
  0x75   : > { %933 = vst.msk [vmem:[%s1523_s19 + $0x78] sm:$0xff] %vm431_vm1, %v917_v17 }
  0x76   : > { %v853_v53 = vadd.f32 %v837_v1, %v804_v58  ;;  %v755_v44 = vadd.f32 %v739_v25, %v706_v4 }
  0x78   : > { %v902_v49 = vadd.f32 %v886_v32, %v853_v53  ;;  %v805_v57 = vadd.f32 %v789_v20, %v755_v44 }
  0x7a   : > { %918 = vst.msk [vmem:[%s1523_s19] sm:$0xff] %vm431_vm1, %v902_v49  ;;  %v854_v26 = vadd.f32 %v838_v21, %v805_v57 }
  0x7c   : > { %v903_v28 = vadd.f32 %v887_v63, %v854_v26 }
  0x7e   : > { %919 = vst.msk [vmem:[%s1523_s19 + $0x8] sm:$0xff] %vm431_vm1, %v903_v28 }
  0x7f PF: > { %s15_s22 = sadd.s32 1, %s1213_s22   ;;  %s1768_s18 = smov %s1205_s20 }
  0x80   : > { %p12_p12 = scmp.ge.s32.totalorder %s15_s22, 6   ;;  %s1769_s19 = smov %s1209_s21 }
  0x81   : > { %s1770_s20 = smov %s1773_s23  ;;  %s1771_s21 = smov %s1777_s24 }
  0x82   :  { %14 = sbr.rel (!%p12_p12) target bundleno = 3 (0x3), region = 79 }

</bundles_post_ra>
